<compile_context>
chip_gen: v7x
topology: tpu7x:2x2x1
jax: 0.10.0
libtpu: 0.0.40
codegen_flags: <defaults>
</compile_context>

<pallas_src>
import jax
import jax.numpy as jnp
from jax.experimental import pallas as pl
from jax.experimental.pallas import tpu as pltpu

_LANE = 128
_SUBLANE = 8
_MAX_ROWS_TILE = 2048          # large-DMA plateau; keeps several parallel tiles
_TARGET_PARALLEL = 4           # >= 2 TensorCores (v7x) with some load balance


def _round_up(x, m):
    return ((x + m - 1) // m) * m


def _alpha_comp_kernel(src_ref, alpha_ref, out_ref, acc_ref):
    # src_ref   : [F, rows, 128]   plane d = D-1-s (batch / depth dims squeezed)
    # alpha_ref : [rows, 128]      alpha of the same plane (channel squeezed)
    # out_ref   : [F, rows, 128]   resident across the depth grid axis
    # acc_ref   : [F, rows, 128]   f32 scratch accumulator (persists across steps)
    s = pl.program_id(2)
    F = src_ref.shape[0]

    @pl.when(s == 0)
    def _init():
        # comp = src[:, D-1]
        acc_ref[...] = src_ref[...].astype(jnp.float32)

    @pl.when(s > 0)
    def _update():
        # comp = src*a + (1-a)*comp  ==  comp + a*(src - comp)
        a = alpha_ref[...].astype(jnp.float32)          # [rows, 128]
        for f in range(F):                              # static unroll; reuse `a` vregs
            c = acc_ref[f]
            acc_ref[f] = c + a * (src_ref[f].astype(jnp.float32) - c)

    @pl.when(s == pl.num_programs(2) - 1)
    def _finalize():
        out_ref[...] = acc_ref[...].astype(out_ref.dtype)


def alpha_composition(src_imgs, alpha_imgs, *, rows_tile=None):
    """Pallas TPU alpha composition.

    src_imgs: [B, D, F, H, W]; alpha_imgs: [B, D, 1, H, W] or [B, D, H, W].
    Returns [B, F, H, W].
    """
    if alpha_imgs.ndim == 4:                            # mirrors unsqueeze(2)
        alpha_imgs = alpha_imgs[:, :, None, :, :]
    B, D, F, H, W = src_imgs.shape
    assert alpha_imgs.shape == (B, D, 1, H, W), alpha_imgs.shape
    HW = H * W

    out_dtype = jnp.result_type(src_imgs.dtype, alpha_imgs.dtype)
    in_item = jnp.dtype(src_imgs.dtype).itemsize
    a_item = jnp.dtype(alpha_imgs.dtype).itemsize
    out_item = jnp.dtype(out_dtype).itemsize

    # ---- lane-dense layout: pad HW only up to a multiple of 128 -------------
    R = -(-HW // _LANE)
    HW_pad = R * _LANE
    src = src_imgs.reshape(B, D, F, HW)
    alpha = alpha_imgs.reshape(B, D, 1, HW)
    if HW_pad != HW:                                    # only when HW % 128 != 0
        pad = HW_pad - HW
        src = jnp.pad(src, ((0, 0), (0, 0), (0, 0), (0, pad)))
        alpha = jnp.pad(alpha, ((0, 0), (0, 0), (0, 0), (0, pad)))
    src = src.reshape(B, D, F, R, _LANE)
    alpha = alpha.reshape(B, D, 1, R, _LANE)

    # ---- generation-aware VMEM budget ---------------------------------------
    try:
        vmem_cap = int(pltpu.get_tpu_info().vmem_capacity_bytes)
    except Exception:                                   # pragma: no cover
        vmem_cap = 64 << 20                             # conservative fallback
    vmem_limit = int(vmem_cap * 0.8)                    # ~103 MiB v5e/v6e, ~51 MiB v7x
    block_budget = vmem_limit - (4 << 20)               # small compiler headroom

    # VMEM bytes per row of 128 lanes (D no longer in the block):
    #   double-buffered src / alpha / out blocks, f32 accumulator scratch,
    #   plus ~2 f32 per-channel temporaries for the elementwise update.
    per_row = _LANE * (2 * F * in_item + 2 * a_item + 2 * F * out_item
                       + F * 4 + 2 * F * 4)

    if rows_tile is None:
        rt = max(_SUBLANE, (block_budget // per_row) // _SUBLANE * _SUBLANE)
        rt = min(rt, _MAX_ROWS_TILE)
        # Keep both v7x TensorCores busy: aim for >= _TARGET_PARALLEL parallel
        # grid points using ragged (not padded) row tiles.
        want_tiles = -(-_TARGET_PARALLEL // B)
        if want_tiles > 1 and R > _SUBLANE:
            split_rt = _round_up(-(-R // want_tiles), _SUBLANE)
            rt = min(rt, split_rt)
        rt = max(rt, _SUBLANE)
        if rt >= R:
            rt = R                                      # single tile == full dim
        rows_tile = rt
    assert rows_tile == R or rows_tile % _SUBLANE == 0, rows_tile

    grid = (B, pl.cdiv(R, rows_tile), D)                # ragged last row tile OK

    out = pl.pallas_call(
        _alpha_comp_kernel,
        out_shape=jax.ShapeDtypeStruct((B, F, R, _LANE), out_dtype),
        grid_spec=pltpu.PrefetchScalarGridSpec(
            num_scalar_prefetch=0,
            grid=grid,
            in_specs=[
                pl.BlockSpec((pl.Squeezed(), pl.Squeezed(), F, rows_tile, _LANE),
                             lambda b, t, s: (b, D - 1 - s, 0, t, 0)),
                pl.BlockSpec((pl.Squeezed(), pl.Squeezed(), pl.Squeezed(),
                              rows_tile, _LANE),
                             lambda b, t, s: (b, D - 1 - s, 0, t, 0)),
            ],
            out_specs=pl.BlockSpec((pl.Squeezed(), F, rows_tile, _LANE),
                                   lambda b, t, s: (b, 0, t, 0)),
            scratch_shapes=[pltpu.VMEM((F, rows_tile, _LANE), jnp.float32)],
        ),
        compiler_params=pltpu.CompilerParams(
            dimension_semantics=("parallel", "parallel", "arbitrary"),
            vmem_limit_bytes=vmem_limit),
    )(src, alpha)

    out = out.reshape(B, F, HW_pad)[:, :, :HW].reshape(B, F, H, W)
    return out


def _alpha_composition_ref(src_imgs, alpha_imgs):
    """Pure-JAX reference mirroring the PyTorch loop."""
    if alpha_imgs.ndim == 4:
        alpha_imgs = alpha_imgs[:, :, None, :, :]
    D = src_imgs.shape[1]
    comp = src_imgs[:, D - 1]
    for d in range(D - 2, -1, -1):
        a = alpha_imgs[:, d]
        comp = src_imgs[:, d] * a + (1.0 - a) * comp
    return comp


if __name__ == "__main__":
    key = jax.random.PRNGKey(0)

    # Main test: lane-aligned spatial size.
    B, D, F, H, W = 2, 4, 3, 16, 16
    k_src, k_alpha, k2s, k2a = jax.random.split(key, 4)
    src_imgs = jax.random.uniform(k_src, (B, D, F, H, W), dtype=jnp.float32)
    alpha_imgs = jax.random.uniform(k_alpha, (B, D, 1, H, W), dtype=jnp.float32)

    out = alpha_composition(src_imgs, alpha_imgs)
    out = jax.block_until_ready(out)
    ref = _alpha_composition_ref(src_imgs, alpha_imgs)
    assert out.shape == (B, F, H, W), out.shape
    assert jnp.allclose(out, ref, atol=1e-5, rtol=1e-5), float(
        jnp.max(jnp.abs(out - ref)))

    # Secondary test: unaligned HW (exercises lane padding) and 4-D alpha input.
    B2, D2, F2, H2, W2 = 1, 3, 3, 10, 10
    src2 = jax.random.uniform(k2s, (B2, D2, F2, H2, W2), dtype=jnp.float32)
    alpha2 = jax.random.uniform(k2a, (B2, D2, H2, W2), dtype=jnp.float32)
    out2 = jax.block_until_ready(alpha_composition(src2, alpha2))
    ref2 = _alpha_composition_ref(src2, alpha2)
    assert out2.shape == (B2, F2, H2, W2), out2.shape
    assert jnp.allclose(out2, ref2, atol=1e-5, rtol=1e-5), float(
        jnp.max(jnp.abs(out2 - ref2)))

    print("KERNEL_OK")
</pallas_src>

<mosaic_0001>
module attributes {stable_mosaic.version = 11 : i64} {
  func.func @_alpha_comp_kernel(%arg0: i32, %arg1: i32, %arg2: i32, %arg3: memref<1x1x3x2x128xf32, #tpu.memory_space<vmem>>, %arg4: memref<1x1x1x2x128xf32, #tpu.memory_space<vmem>>, %arg5: memref<1x3x2x128xf32, #tpu.memory_space<vmem>>, %arg6: memref<3x2x128xf32, #tpu.memory_space<vmem>>) attributes {dimension_semantics = [#tpu.dimension_semantics<parallel>, #tpu.dimension_semantics<parallel>, #tpu.dimension_semantics<arbitrary>], iteration_bounds = array<i64: 2, 1, 4>, scalar_prefetch = 0 : i64, scratch_operands = 1 : i64, tpu.core_type = #tpu.core_type<tc>, window_params = [{transform_indices = @transform_0, window_bounds = array<i64: 1, 1, 3, 2, 128>}, {transform_indices = @transform_1, window_bounds = array<i64: 1, 1, 1, 2, 128>}, {transform_indices = @transform_2, window_bounds = array<i64: 1, 3, 2, 128>}]} {
    %c0_i32 = arith.constant 0 : i32
    %0 = arith.cmpi eq, %arg2, %c0_i32 : i32
    %1 = arith.extui %0 : i1 to i32
    %c0_i32_0 = arith.constant 0 : i32
    %2 = arith.cmpi ne, %1, %c0_i32_0 : i32
    scf.if %2 {
      %c0 = arith.constant 0 : index
      %c0_4 = arith.constant 0 : index
      %c0_5 = arith.constant 0 : index
      %c0_6 = arith.constant 0 : index
      %c0_7 = arith.constant 0 : index
      %9 = vector.load %arg3[%c0, %c0_4, %c0_5, %c0_6, %c0_7] : memref<1x1x3x2x128xf32, #tpu.memory_space<vmem>>, vector<1x1x3x2x128xf32>
      %10 = vector.shape_cast %9 : vector<1x1x3x2x128xf32> to vector<3x2x128xf32>
      %c0_8 = arith.constant 0 : index
      %c0_9 = arith.constant 0 : index
      %c0_10 = arith.constant 0 : index
      %11 = vector.load %arg6[%c0_8, %c0_9, %c0_10] : memref<3x2x128xf32, #tpu.memory_space<vmem>>, vector<3x2x128xf32>
      tpu.vector_store %arg6[%c0_8, %c0_9, %c0_10], %10 {strides = array<i32>} : memref<3x2x128xf32, #tpu.memory_space<vmem>>, vector<3x2x128xf32>,
    } else {
    }
    %c0_i32_1 = arith.constant 0 : i32
    %3 = arith.cmpi sgt, %arg2, %c0_i32_1 : i32
    %4 = arith.extui %3 : i1 to i32
    %c0_i32_2 = arith.constant 0 : i32
    %5 = arith.cmpi ne, %4, %c0_i32_2 : i32
    scf.if %5 {
      %c0 = arith.constant 0 : index
      %c0_4 = arith.constant 0 : index
      %c0_5 = arith.constant 0 : index
      %c0_6 = arith.constant 0 : index
      %c0_7 = arith.constant 0 : index
      %9 = vector.load %arg4[%c0, %c0_4, %c0_5, %c0_6, %c0_7] : memref<1x1x1x2x128xf32, #tpu.memory_space<vmem>>, vector<1x1x1x2x128xf32>
      %10 = vector.shape_cast %9 : vector<1x1x1x2x128xf32> to vector<2x128xf32>
      %c0_8 = arith.constant 0 : index
      %c0_9 = arith.constant 0 : index
      %c0_10 = arith.constant 0 : index
      %11 = vector.load %arg6[%c0_8, %c0_9, %c0_10] : memref<3x2x128xf32, #tpu.memory_space<vmem>>, vector<1x2x128xf32>
      %12 = vector.shape_cast %11 : vector<1x2x128xf32> to vector<2x128xf32>
      %c0_11 = arith.constant 0 : index
      %c0_12 = arith.constant 0 : index
      %c0_13 = arith.constant 0 : index
      %c0_14 = arith.constant 0 : index
      %c0_15 = arith.constant 0 : index
      %13 = vector.load %arg3[%c0_11, %c0_12, %c0_13, %c0_14, %c0_15] : memref<1x1x3x2x128xf32, #tpu.memory_space<vmem>>, vector<1x1x1x2x128xf32>
      %14 = vector.shape_cast %13 : vector<1x1x1x2x128xf32> to vector<2x128xf32>
      %15 = arith.subf %14, %12 : vector<2x128xf32>
      %16 = arith.mulf %10, %15 : vector<2x128xf32>
      %17 = arith.addf %12, %16 : vector<2x128xf32>
      %c0_16 = arith.constant 0 : index
      %c0_17 = arith.constant 0 : index
      %c0_18 = arith.constant 0 : index
      %18 = vector.load %arg6[%c0_16, %c0_17, %c0_18] : memref<3x2x128xf32, #tpu.memory_space<vmem>>, vector<1x2x128xf32>
      %19 = vector.shape_cast %18 : vector<1x2x128xf32> to vector<2x128xf32>
      %20 = vector.shape_cast %17 : vector<2x128xf32> to vector<1x2x128xf32>
      tpu.vector_store %arg6[%c0_16, %c0_17, %c0_18], %20 {strides = array<i32>} : memref<3x2x128xf32, #tpu.memory_space<vmem>>, vector<1x2x128xf32>,
      %c1 = arith.constant 1 : index
      %c0_19 = arith.constant 0 : index
      %c0_20 = arith.constant 0 : index
      %21 = vector.load %arg6[%c1, %c0_19, %c0_20] : memref<3x2x128xf32, #tpu.memory_space<vmem>>, vector<1x2x128xf32>
      %22 = vector.shape_cast %21 : vector<1x2x128xf32> to vector<2x128xf32>
      %c0_21 = arith.constant 0 : index
      %c0_22 = arith.constant 0 : index
      %c1_23 = arith.constant 1 : index
      %c0_24 = arith.constant 0 : index
      %c0_25 = arith.constant 0 : index
      %23 = vector.load %arg3[%c0_21, %c0_22, %c1_23, %c0_24, %c0_25] : memref<1x1x3x2x128xf32, #tpu.memory_space<vmem>>, vector<1x1x1x2x128xf32>
      %24 = vector.shape_cast %23 : vector<1x1x1x2x128xf32> to vector<2x128xf32>
      %25 = arith.subf %24, %22 : vector<2x128xf32>
      %26 = arith.mulf %10, %25 : vector<2x128xf32>
      %27 = arith.addf %22, %26 : vector<2x128xf32>
      %c1_26 = arith.constant 1 : index
      %c0_27 = arith.constant 0 : index
      %c0_28 = arith.constant 0 : index
      %28 = vector.load %arg6[%c1_26, %c0_27, %c0_28] : memref<3x2x128xf32, #tpu.memory_space<vmem>>, vector<1x2x128xf32>
      %29 = vector.shape_cast %28 : vector<1x2x128xf32> to vector<2x128xf32>
      %30 = vector.shape_cast %27 : vector<2x128xf32> to vector<1x2x128xf32>
      tpu.vector_store %arg6[%c1_26, %c0_27, %c0_28], %30 {strides = array<i32>} : memref<3x2x128xf32, #tpu.memory_space<vmem>>, vector<1x2x128xf32>,
      %c2 = arith.constant 2 : index
      %c0_29 = arith.constant 0 : index
      %c0_30 = arith.constant 0 : index
      %31 = vector.load %arg6[%c2, %c0_29, %c0_30] : memref<3x2x128xf32, #tpu.memory_space<vmem>>, vector<1x2x128xf32>
      %32 = vector.shape_cast %31 : vector<1x2x128xf32> to vector<2x128xf32>
      %c0_31 = arith.constant 0 : index
      %c0_32 = arith.constant 0 : index
      %c2_33 = arith.constant 2 : index
      %c0_34 = arith.constant 0 : index
      %c0_35 = arith.constant 0 : index
      %33 = vector.load %arg3[%c0_31, %c0_32, %c2_33, %c0_34, %c0_35] : memref<1x1x3x2x128xf32, #tpu.memory_space<vmem>>, vector<1x1x1x2x128xf32>
      %34 = vector.shape_cast %33 : vector<1x1x1x2x128xf32> to vector<2x128xf32>
      %35 = arith.subf %34, %32 : vector<2x128xf32>
      %36 = arith.mulf %10, %35 : vector<2x128xf32>
      %37 = arith.addf %32, %36 : vector<2x128xf32>
      %c2_36 = arith.constant 2 : index
      %c0_37 = arith.constant 0 : index
      %c0_38 = arith.constant 0 : index
      %38 = vector.load %arg6[%c2_36, %c0_37, %c0_38] : memref<3x2x128xf32, #tpu.memory_space<vmem>>, vector<1x2x128xf32>
      %39 = vector.shape_cast %38 : vector<1x2x128xf32> to vector<2x128xf32>
      %40 = vector.shape_cast %37 : vector<2x128xf32> to vector<1x2x128xf32>
      tpu.vector_store %arg6[%c2_36, %c0_37, %c0_38], %40 {strides = array<i32>} : memref<3x2x128xf32, #tpu.memory_space<vmem>>, vector<1x2x128xf32>,
    } else {
    }
    %c3_i32 = arith.constant 3 : i32
    %6 = arith.cmpi eq, %arg2, %c3_i32 : i32
    %7 = arith.extui %6 : i1 to i32
    %c0_i32_3 = arith.constant 0 : i32
    %8 = arith.cmpi ne, %7, %c0_i32_3 : i32
    scf.if %8 {
      %c0 = arith.constant 0 : index
      %c0_4 = arith.constant 0 : index
      %c0_5 = arith.constant 0 : index
      %9 = vector.load %arg6[%c0, %c0_4, %c0_5] : memref<3x2x128xf32, #tpu.memory_space<vmem>>, vector<3x2x128xf32>
      %c0_6 = arith.constant 0 : index
      %c0_7 = arith.constant 0 : index
      %c0_8 = arith.constant 0 : index
      %c0_9 = arith.constant 0 : index
      %10 = vector.load %arg5[%c0_6, %c0_7, %c0_8, %c0_9] : memref<1x3x2x128xf32, #tpu.memory_space<vmem>>, vector<1x3x2x128xf32>
      %11 = vector.shape_cast %10 : vector<1x3x2x128xf32> to vector<3x2x128xf32>
      %12 = vector.shape_cast %9 : vector<3x2x128xf32> to vector<1x3x2x128xf32>
      tpu.vector_store %arg5[%c0_6, %c0_7, %c0_8, %c0_9], %12 {strides = array<i32>} : memref<1x3x2x128xf32, #tpu.memory_space<vmem>>, vector<1x3x2x128xf32>,
    } else {
    }
    return
  }
  func.func @transform_0(%arg0: i32, %arg1: i32, %arg2: i32) -> (i32, i32, i32, i32, i32) {
    %c3_i32 = arith.constant 3 : i32
    %0 = arith.subi %c3_i32, %arg2 : i32
    %c0_i32 = arith.constant 0 : i32
    %c0_i32_0 = arith.constant 0 : i32
    %c0_i32_1 = arith.constant 0 : i32
    return %arg0, %0, %c0_i32, %arg1, %c0_i32_0 : i32, i32, i32, i32, i32
  }
  func.func @transform_1(%arg0: i32, %arg1: i32, %arg2: i32) -> (i32, i32, i32, i32, i32) {
    %c3_i32 = arith.constant 3 : i32
    %0 = arith.subi %c3_i32, %arg2 : i32
    %c0_i32 = arith.constant 0 : i32
    %c0_i32_0 = arith.constant 0 : i32
    %c0_i32_1 = arith.constant 0 : i32
    return %arg0, %0, %c0_i32, %arg1, %c0_i32_0 : i32, i32, i32, i32, i32
  }
  func.func @transform_2(%arg0: i32, %arg1: i32, %arg2: i32) -> (i32, i32, i32, i32) {
    %c0_i32 = arith.constant 0 : i32
    %c0_i32_0 = arith.constant 0 : i32
    %c0_i32_1 = arith.constant 0 : i32
    return %arg0, %c0_i32, %arg1, %c0_i32_0 : i32, i32, i32, i32
  }
}

</mosaic_0001>

<bundles_post_ra>
// kernel: tpu_custom_call.1
= control target key start
LH: loop header
LB: loop body
LE: loop exit
PB: predicated region body
PF: predicated region fallthrough
CT: control target
= control target key end

     0   :  { %s1046_s0 = inlined_call_operand.hbm [shape: f32[2,4,3,2,128], index: 0, kind: input, shape index: {}]   ;;  %s1047_s1 = inlined_call_operand.hbm [shape: f32[2,4,1,2,128], index: 1, kind: input, shape index: {}]   ;;  %s1048_s2 = inlined_call_operand.hbm [shape: f32[2,3,2,128], index: 2, kind: output, shape index: {}]  }
   0x1   :  { %1056 = sst [smem:[#allocation19_spill]] %s1046_s0 }
   0x2   :  { %7 = vsyncpa [#allocation4], 0 }
   0x3   :  { %9 = vsyncpa [#allocation4 + $0x1], 0 }
   0x4   :  { %10 = vsyncpa [#allocation7], 0 }
   0x5   :  { %12 = vsyncpa [#allocation7 + $0x1], 0 }
   0x6   :  { %13 = vsyncpa [#allocation5], 0 }
   0x7   :  { %15 = vsyncpa [#allocation5 + $0x1], 0  ;;  %s768_s9 = smov 0   ;;  %s770_s10 = smov 0  }
   0x8   :  { %s772_s11 = smov 0   ;;  %s774_s12 = smov 0  }
   0x9   :  { %s776_s13 = smov 0   ;;  %s778_s14 = smov 0  }
   0xa   :  { %s780_s15 = smov 0   ;;  %s782_s16 = smov 0  }
   0xb   :  { %s784_s17 = smov 0   ;;  %s786_s18 = smov 0  }
   0xc   :  { %s788_s19 = smov 0  }
   0xd LB: > { %1057 = sst [smem:[#allocation12_spill]] %s712_s11  ;;  %s423_s20 = sadd.s32 4294967295, %s744_s19   ;;  %s744_s19 = sphi %s788_s19, %s21_s19   ;;  %s740_s18 = sphi %s786_s18, %s1086_s18   ;;  %s736_s17 = sphi %s784_s17, %s1079_s17   ;;  %s732_s16 = sphi %s782_s16, %s1085_s16   ;;  %s728_s15 = sphi %s780_s15, %s1078_s15   ;;  %s724_s14 = sphi %s778_s14, %s1077_s14   ;;  %s720_s13 = sphi %s776_s13, %s1084_s13   ;;  %s716_s12 = sphi %s774_s12, %s1083_s12   ;;  %s712_s11 = sphi %s772_s11, %s1075_s11   ;;  %s708_s10 = sphi %s770_s10, %s1082_s10   ;;  %s704_s9 = sphi %s768_s9, %s1081_s9  }
   0xe   : > { %1058 = sst [smem:[#allocation13_spill]] %s724_s14  ;;  %s424_s21 = sadd.s32 4294967294, %s744_s19  }
   0xf   : > { %1059 = sst [smem:[#allocation14_spill]] %s736_s17  ;;  %s33_s22 = sadd.s32 1, %s736_s17 }
  0x10   : > { %s40_s23 = sadd.s32 1, %s740_s18  ;;  %p34_p0 = scmp.ge.s32.totalorder %s33_s22, 4 }
  0x11   : > { %s828_s24 = ssub.s32 3, %s736_s17  ;;  %s53_s25 = sadd.s32 1, %s724_s14 }
  0x12   : > { %p60_p1 = scmp.ne.s32.totalorder %s724_s14, %s720_s13  ;;  %s1088_s22 = smov (%p34_p0, %s33_s22), 0 }
  0x13   : > { %1060 = sst [smem:[#allocation15_spill]] %s1088_s22  ;;  %s1090_s23 = smov (!%p34_p0, %s40_s23), %s740_s18 }
  0x14   : > { %s45_s26 = ssub.s32 3, %s1088_s22  ;;  %p61_p2 = scmp.eq.s32.totalorder %s744_s19, 0 }
  0x15   : > { %p42_p3 = scmp.ge.s32.totalorder %s1090_s23, 2  ;;  %s47_s27 = ssub.s32 %s828_s24, %s45_s26 }
  0x16   : > { %p839_p4 = por %p61_p2, %p60_p1  ;;  %p66_p5 = scmp.ne.s32.totalorder %s720_s13, %s716_s12 }
  0x17   : > { %s1092_s23 = smov (%p42_p3, %s1090_s23), 0  ;;  %p67_p6 = scmp.eq.s32.totalorder %s423_s20, 0 }
  0x18   : > { %1062 = sst [smem:[#allocation16_spill]] %s1092_s23  ;;  %s113_s29 = sadd.s32 1, %s712_s11 }
  0x19   : > { %s46_s30 = ssub.s32 %s740_s18, %s1092_s23  ;;  %p123_p7 = scmp.ne.s32.totalorder %s712_s11, %s708_s10 }
  0x1a   : > { %s48_s3 = sor.u32 %s47_s27, %s46_s30  ;;  %p852_p8 = por %p67_p6, %p66_p5 }
  0x1b   : > { %p51_p9 = scmp.eq.s32.totalorder %s48_s3, 0  ;;  %p111_p10 = scmp.eq.s32.totalorder %s46_s30, 0 }
  0x1c   : > { %s1063_s4 = scalar_select %p852_p8, 1, 0 }
  0x1d   : > { %p124_p11 = scmp.eq.s32.totalorder %s423_s20, 7  ;;  %p129_p12 = scmp.ne.s32.totalorder %s708_s10, %s704_s9 }
  0x1e   : > { %s859_s5 = scalar_select %p51_p9, %s724_s14, %s53_s25  }
  0x1f   : > { %s862_s6 = scalar_select %p111_p10, %s712_s11, %s113_s29  }
  0x20   : > { %1064 = sst [smem:[#allocation17_spill]] %s859_s5  ;;  %p864_p13 = por %p124_p11, %p123_p7 }
  0x21   : > { %1065 = sst [smem:[#allocation18_spill]] %s862_s6  ;;  %p130_p0 = scmp.eq.s32.totalorder %s424_s21, 7 }
  0x22   : > { %s1066_s7 = scalar_select %p864_p13, 1, 0 }
  0x23   : > { %p464_p1 = scmp.lt.s32.totalorder %s744_s19, 8  ;;  %p869_p2 = por %p130_p0, %p129_p12 }
  0x24   : > { %s874_s12 = sand.u32 1, %s724_s14   ;;  %s442_s26 = smul.u32 3, %s828_s24 }
  0x25   : > { %s1067_s8 = scalar_select %p869_p2, 1, 0 }
  0x26   : > { %s441_s20 = smul.u32 6, %s874_s12  ;;  %p880_p3 = pnand %p464_p1, %p839_p4 }
  0x27   : > { %s443_s27 = smul.u32 12, %s740_s18  ;;  %s1069_s0 = sld [smem:[#allocation19_spill]] }
  0x28   : > { %s154_s21 = scalar_lea.vmem [#allocation3], %s441_s20  ;;  %s151_s28 = scalar_lea.sflag [#allocation4], %s874_s12 }
  0x29   : > { %s165_s29 = sshll.u32 %s154_s21, 4  ;;  %s162_s30 = sadd.s32 %s443_s27, %s442_s26  ;;  %s885_s29 = int_to_ptr.vmem [resolvable:$true] %s165_s29 }
  0x2a   : > { %s427_s3 = sshll.u32 %s162_s30, 5  ;;  %p560_p5 = pneg %p880_p3 }
  0x2d   : > { %s890_s17 = scalar_lea.hbm %s1069_s0, %s427_s3  ;;  %s563_s27 = scalar_lea.hbm %s1069_s0, 768 }
  0x2e   : > { %s558_s5 = scalar_lea.hbm %s890_s17, 96  ;;  %p564_p9 = scmp.lt.u32.totalorder %s890_s17, %s1069_s0 }
  0x2f   : > { %p559_p4 = scmp.ne.s32.totalorder %s890_s17, %s558_s5  ;;  %p565_p10 = scmp.lt.u32.totalorder %s563_s27, %s558_s5 }
  0x30   : > { %p567_p12 = scmp.lt.u32.totalorder %s558_s5, %s890_s17 }
  0x31   : > { %p561_p6 = pnand %p560_p5, %p559_p4  ;;  %p566_p11 = por %p565_p10, %p564_p9 }
  0x33   : > { %p562_p7 = pneg %p561_p6  ;;  %p568_p0 = por %p567_p12, %p566_p11 }
  0x35   : > { %p569_p1 = pnand %p568_p0, %p562_p7 }
  0x37   : > { %572 = shalt.err (!%p569_p1)
}
  0x38   : > { %s573_s21 = scalar_lea.vmem %s885_s29, 96  ;;  %s746_s30 = smov [#allocation3]  }
  0x39   : > { %p574_p4 = scmp.ne.s32.totalorder %s885_s29, %s573_s21  ;;  %s578_s3 = sshll.u32 %s746_s30, 4  ;;  %s579_s3 = int_to_ptr.vmem [resolvable:$false] %s578_s3 }
  0x3a   : > { %s580_s20 = scalar_lea.vmem %s579_s3, 192  ;;  %p581_p13 = scmp.lt.s32.totalorder %s885_s29, %s579_s3 }
  0x3b   : > { %p576_p6 = pnand %p574_p4, %p560_p5  ;;  %p582_p9 = scmp.lt.s32.totalorder %s580_s20, %s573_s21 }
  0x3d   : > { %p577_p2 = pneg %p576_p6  ;;  %p583_p10 = por %p582_p9, %p581_p13 }
  0x3f   : > { %p584_p11 = pnand %p583_p10, %p577_p2 }
  0x41   : > { %587 = shalt.err (!%p584_p11)
}
  0x42   : > { %s747_s5 = smov 32   ;;  %s748_s26 = smov 2  }
  0x43   : > { %456 = dma.hbm_to_vmem [thread:$0]  (!%p880_p3), %s890_s17, 96, %s885_s29, %s151_s28, %s747_s5, %s747_s5, %s748_s26  }
  0x44   : > { %p431_p7 = scmp.ge.s32.totalorder %s744_s19, 1  ;;  %p195_p13 = scmp.lt.s32.totalorder %s744_s19, 9 }
  0x45   : > { %s428_s27 = sshll.u32 %s874_s12, 1  ;;  %s429_s23 = sshll.u32 %s740_s18, 2 }
  0x46   : > { %p923_p2 = pnand %p431_p7, %p195_p13  ;;  %s179_s21 = scalar_lea.vmem [#allocation6], %s428_s27 }
  0x47   : > { %s190_s30 = sshll.u32 %s179_s21, 4  ;;  %s186_s3 = sadd.s32 %s429_s23, %s828_s24  ;;  %s929_s30 = int_to_ptr.vmem [resolvable:$true] %s190_s30 }
  0x48   : > { %s430_s20 = sshll.u32 %s186_s3, 5  ;;  %s176_s11 = scalar_lea.sflag [#allocation7], %s874_s12 }
  0x49   : > { %s188_s6 = scalar_lea.hbm %s1047_s1, %s430_s20  ;;  %s593_s5 = scalar_lea.hbm %s1047_s1, 256 }
  0x4a   : > { %s588_s17 = scalar_lea.hbm %s188_s6, 32  ;;  %p594_p4 = scmp.lt.u32.totalorder %s188_s6, %s1047_s1 }
  0x4b   : > { %p589_p12 = scmp.ne.s32.totalorder %s188_s6, %s588_s17  ;;  %p595_p6 = scmp.lt.u32.totalorder %s593_s5, %s588_s17 }
  0x4c   : > { %p597_p10 = scmp.lt.u32.totalorder %s588_s17, %s188_s6 }
  0x4d   : > { %p591_p0 = pnand %p589_p12, %p560_p5  ;;  %p596_p9 = por %p595_p6, %p594_p4 }
  0x4f   : > { %p592_p1 = pneg %p591_p0  ;;  %p598_p11 = por %p597_p10, %p596_p9 }
  0x51   : > { %p599_p7 = pnand %p598_p11, %p592_p1 }
  0x53   : > { %602 = shalt.err (!%p599_p7)
}
  0x54   : > { %s603_s0 = scalar_lea.vmem %s929_s30, 32  ;;  %s749_s14 = smov [#allocation6]  }
  0x55   : > { %p604_p13 = scmp.ne.s32.totalorder %s929_s30, %s603_s0  ;;  %s608_s12 = sshll.u32 %s749_s14, 4  ;;  %s609_s12 = int_to_ptr.vmem [resolvable:$false] %s608_s12 }
  0x56   : > { %s610_s27 = scalar_lea.vmem %s609_s12, 64  ;;  %p611_p8 = scmp.lt.s32.totalorder %s929_s30, %s609_s12 }
  0x57   : > { %p606_p12 = pnand %p604_p13, %p560_p5  ;;  %p612_p4 = scmp.lt.s32.totalorder %s610_s27, %s603_s0 }
  0x59   : > { %p607_p0 = pneg %p606_p12  ;;  %p613_p6 = por %p612_p4, %p611_p8 }
  0x5b   : > { %p614_p9 = pnand %p613_p6, %p607_p0 }
  0x5d   : > { %617 = shalt.err (!%p614_p9)
}
  0x5e   : > { %459 = dma.hbm_to_vmem [thread:$0]  (!%p880_p3), %s188_s6, 32, %s929_s30, %s176_s11  }
  0x5f   : > { %199 = sbr.rel (%p923_p2) target bundleno = 161 (0xa1), region = 28  ;;  %s201_s23 = sand.u32 (!%p923_p2), 1, %s720_s13  }
  0x60   : > { %s444_s21 = smul.u32 (!%p923_p2), 6, %s201_s23  ;;  %s202_s3 = scalar_lea.sflag (!%p923_p2), [#allocation4], %s201_s23 }
  0x61   : > { %p1071_p5 = scmp.ne.s32.totalorder (!%p923_p2), %s1063_s4, 0 }
  0x62   : > { %s205_s20 = scalar_lea.vmem (!%p923_p2), [#allocation3], %s444_s21 }
  0x66   : > { %691 = dma.done.wait (%p1071_p5), %s202_s3, 96  }
  0x67   : > { %693 = vsyncadd (%p1071_p5), %s202_s3, 4294967200  ;;  %s432_s17 = sshll.u32 %s201_s23, 1  ;;  %s211_s29 = scalar_lea.sflag [#allocation7], %s201_s23 }
  0x68   : > { %s214_s25 = scalar_lea.vmem [#allocation6], %s432_s17 }
  0x69   : > { %695 = dma.done.wait (%p1071_p5), %s211_s29, 32  }
  0x6a   : > { %697 = vsyncadd (%p1071_p5), %s211_s29, 4294967264  ;;  %s237_s11 = sand.u32 1, %s708_s10   ;;  %p433_p8 = scmp.ne.s32.totalorder %s728_s15, 0 }
  0x6b   : > { %s445_s6 = smul.u32 6, %s237_s11  ;;  %v246_v0 = vld [vmem:[%s205_s20] sm:$0xf] (!%p433_p8)   ;;  %v248_v1 = vld [vmem:[%s205_s20 + $0x4] sm:$0x3] (!%p433_p8) }
  0x6c   : > { %245 = sbr.rel (%p433_p8) target bundleno = 115 (0x73), region = 40  ;;  %249 = vst [vmem:[#allocation2] sm:$0xf] (!%p433_p8), %v246_v0   ;;  %251 = vst [vmem:[#allocation2 + $0x4] sm:$0x3] (!%p433_p8), %v248_v1 }
  0x6d   : > { %s967_s22 = scalar_lea.vmem [#allocation8], %s445_s6 }
  0x73 PF: > { %p434_p3 = scmp.le.s32.totalorder %s728_s15, 0 }
  0x74   : > { %v256_v2 = vld [vmem:[%s214_s25] sm:$0x3] (!%p434_p3)  ;;  %v257_v3 = vld [vmem:[#allocation2] sm:$0x3] (!%p434_p3)  ;;  %v258_v4 = vld [vmem:[%s205_s20] sm:$0x3] (!%p434_p3) }
  0x75   : > { %255 = sbr.rel (%p434_p3) target bundleno = 126 (0x7e), region = 44  ;;  %v259_v5 = vsub.f32 (!%p434_p3), %v258_v4, %v257_v3  ;;  %v264_v6 = vld [vmem:[#allocation2 + $0x2] sm:$0x3] (!%p434_p3)  ;;  %v435_v7 = vld [vmem:[%s205_s20 + $0x2] sm:$0x3] (!%p434_p3) }
  0x76   : > { %v272_v8 = vld [vmem:[#allocation2 + $0x4] sm:$0x3] (!%p434_p3)  ;;  %v267_v9 = vsub.f32 (!%p434_p3), %v435_v7, %v264_v6  ;;  %v436_v10 = vld [vmem:[%s205_s20 + $0x4] sm:$0x3] (!%p434_p3) }
  0x77   : > { %v260_v11 = vmul.f32 (!%p434_p3), %v259_v5, %v256_v2  ;;  %v275_v12 = vsub.f32 (!%p434_p3), %v436_v10, %v272_v8 }
  0x78   : > { %v268_v13 = vmul.f32 (!%p434_p3), %v267_v9, %v256_v2 }
  0x79   : > { %v261_v14 = vadd.f32 (!%p434_p3), %v260_v11, %v257_v3  ;;  %v276_v15 = vmul.f32 (!%p434_p3), %v275_v12, %v256_v2 }
  0x7a   : > { %v269_v16 = vadd.f32 (!%p434_p3), %v268_v13, %v264_v6 }
  0x7b   : > { %262 = vst [vmem:[#allocation2] sm:$0x3] (!%p434_p3), %v261_v14  ;;  %v277_v17 = vadd.f32 (!%p434_p3), %v276_v15, %v272_v8 }
  0x7c   : > { %270 = vst [vmem:[#allocation2 + $0x2] sm:$0x3] %v269_v16 }
  0x7d   : > { %278 = vst [vmem:[#allocation2 + $0x4] sm:$0x3] %v277_v17 }
  0x7e PF: > { %p437_p2 = scmp.ne.s32.totalorder %s728_s15, 3 }
  0x80   : > { %282 = sbr.rel (%p437_p2) target bundleno = 135 (0x87), region = 48 }
  0x84   : > { %v285_v19 = vld [vmem:[#allocation2 + $0x4] sm:$0x3] (!%p437_p2) }
  0x85   : > { %v283_v18 = vld [vmem:[#allocation2] sm:$0xf] (!%p437_p2)   ;;  %288 = vst [vmem:[%s967_s22 + $0x4] sm:$0x3] (!%p437_p2), %v285_v19 }
  0x86   : > { %286 = vst [vmem:[%s967_s22] sm:$0xf] (!%p437_p2), %v283_v18  }
  0x87 PF: > { %s446_s4 = smul.u32 96, %s732_s16  ;;  %s304_s30 = sshll.u32 %s967_s22, 4  ;;  %s981_s30 = int_to_ptr.vmem [resolvable:$true] %s304_s30 }
  0x88   : > { %s985_s15 = scalar_lea.sflag [#allocation5], %s237_s11  ;;  %s618_s24 = scalar_lea.vmem %s981_s30, 96 }
  0x89   : > { %s979_s26 = scalar_lea.hbm %s1048_s2, %s446_s4  ;;  %p619_p1 = scmp.ne.s32.totalorder %s981_s30, %s618_s24 }
  0x8a   : > { %p1072_p10 = scmp.ne.s32.totalorder %s1066_s7, 0  ;;  %s750_s16 = smov [#allocation8]  }
  0x8b   : > { %s622_s0 = sshll.u32 %s750_s16, 4  ;;  %s623_s0 = int_to_ptr.vmem [resolvable:$false] %s622_s0 }
  0x8c   : > { %p620_p11 = pnand %p619_p1, %p1072_p10  ;;  %s624_s14 = scalar_lea.vmem %s623_s0, 192 }
  0x8d   : > { %p625_p13 = scmp.lt.s32.totalorder %s981_s30, %s623_s0  ;;  %p626_p12 = scmp.lt.s32.totalorder %s624_s14, %s618_s24 }
  0x8e   : > { %p621_p7 = pneg %p620_p11 }
  0x8f   : > { %p627_p0 = por %p626_p12, %p625_p13 }
  0x91   : > { %p628_p4 = pnand %p627_p0, %p621_p7 }
  0x93   : > { %631 = shalt.err (!%p628_p4)
}
  0x94   : > { %s632_s12 = scalar_lea.hbm %s979_s26, 96  ;;  %s636_s21 = scalar_lea.hbm %s1048_s2, 192 }
  0x95   : > { %p633_p6 = scmp.ne.s32.totalorder %s979_s26, %s632_s12  ;;  %p637_p8 = scmp.lt.u32.totalorder %s979_s26, %s1048_s2 }
  0x96   : > { %p638_p3 = scmp.lt.u32.totalorder %s636_s21, %s632_s12  ;;  %p640_p1 = scmp.lt.u32.totalorder %s632_s12, %s979_s26 }
  0x97   : > { %p634_p9 = pnand %p633_p6, %p1072_p10 }
  0x98   : > { %p639_p2 = por %p638_p3, %p637_p8 }
  0x99   : > { %p635_p5 = pneg %p634_p9 }
  0x9a   : > { %p641_p11 = por %p640_p1, %p639_p2 }
  0x9c   : > { %p642_p7 = pnand %p641_p11, %p635_p5 }
  0x9e   : > { %645 = shalt.err (!%p642_p7)
}
  0x9f   : > { %s751_s17 = smov 32   ;;  %s752_s29 = smov 2  }
  0xa0   : > { %451 = dma.vmem_to_hbm [thread:$0]  (%p1072_p10), %s981_s30, 96, %s979_s26, %s985_s15, %s751_s17, %s751_s17, %s752_s29  }
  0xa1 PF: > { %p465_p13 = scmp.ge.s32.totalorder %s744_s19, 2  ;;  %s319_s25 = sand.u32 1, %s704_s9  }
  0xa2   : > { %p1073_p12 = scmp.ne.s32.totalorder %s1067_s8, 0  ;;  %s320_s11 = scalar_lea.sflag [#allocation5], %s319_s25 }
  0xa4   : > { %p461_p0 = pnand %p465_p13, %p1073_p12 }
  0xa6   : > { %699 = dma.done.wait (!%p461_p0), %s320_s11, 96  }
  0xa7   : > { %701 = vsyncadd (!%p461_p0), %s320_s11, 4294967200  ;;  %s21_s19 = sadd.s32 1, %s744_s19   ;;  %s1074_s6 = sld [smem:[#allocation12_spill]] }
  0xa8   : > { %p18_p4 = scmp.ge.s32.totalorder %s21_s19, 10   ;;  %s1075_s11 = sld [smem:[#allocation18_spill]] }
  0xa9   : > { %s1076_s7 = sld [smem:[#allocation13_spill]]  ;;  %s1077_s14 = sld [smem:[#allocation17_spill]] }
  0xaa   : > { %s1078_s15 = sld [smem:[#allocation14_spill]]  ;;  %s1079_s17 = sld [smem:[#allocation15_spill]] }
  0xab   : > { %s1080_s22 = sld [smem:[#allocation16_spill]]  ;;  %s1081_s9 = smov %s708_s10 }
  0xac   : > { %s1083_s12 = smov %s720_s13  ;;  %s1085_s16 = smov %s740_s18 }
  0xad   : > { %s1082_s10 = smov %s1074_s6  ;;  %20 = sbr.rel (!%p18_p4) target bundleno = 13 (0xd), region = 102 }
  0xaf   : > { %s1084_s13 = smov %s1076_s7 }
  0xb1   : > { %s1086_s18 = smov %s1080_s22 }
  0xb4   :  { %325 = vsyncpa [#allocation4], 1 }
  0xb5   :  { %327 = vsyncpa [#allocation4 + $0x1], 1 }
  0xb6   :  { %328 = vsyncpa [#allocation7], 1 }
  0xb7   :  { %330 = vsyncpa [#allocation7 + $0x1], 1 }
  0xb8   :  { %331 = vsyncpa [#allocation5], 1 }
  0xb9   :  { %333 = vsyncpa [#allocation5 + $0x1], 1 }

</bundles_post_ra>
